<compile_context>
chip_gen: v7x
topology: tpu7x:2x2x1
jax: 0.10.0
libtpu: 0.0.40
codegen_flags: <defaults>
</compile_context>

<pallas_src>
import functools

import jax
import jax.numpy as jnp
from jax import lax
from jax.experimental import pallas as pl
from jax.experimental.pallas import tpu as pltpu

_SUBLANE = 8
# Budget for the double-buffered (tm, N) scores blocks; well under v7x's 64 MiB physical
# VMEM and under the explicit limit below, so DMA/compute overlap survives everywhere.
_SCORES_VMEM_BUDGET = 24 * 1024 * 1024
_VMEM_LIMIT_BYTES = 32 * 1024 * 1024
_MAX_TILE_ROWS = 1024


def _round_up(x, m):
    return (x + m - 1) // m * m


def _pick_tile_rows(n, itemsize):
    """VMEM-budget / dtype-aware row-tile size (always a multiple of 8)."""
    row_bytes = max(1, n * itemsize)
    tm = _SCORES_VMEM_BUDGET // (2 * row_bytes)          # 2x: double-buffered scores block
    tm = min(tm, _MAX_TILE_ROWS, _round_up(n, _SUBLANE))
    tm = max(_SUBLANE, (tm // _SUBLANE) * _SUBLANE)
    return tm


def _compute_dtype(dtype):
    # bf16 VALUs exist on v6e/v7x: keep elementwise math packed; upcast only when folding
    # into the f32 partial outputs.  Everything else computes in f32.
    return jnp.bfloat16 if dtype == jnp.bfloat16 else jnp.float32


def _sum_kernel(diag_row_ref, diag_col_ref, scores_ref, psum_ref, *,
                margin, tm, n_rows, has_pad):
    """VSE0 path: per-step sublane-folded partial sums of cost_s + cost_im."""
    cdt = _compute_dtype(scores_ref.dtype)
    s = scores_ref[...].astype(cdt)                      # (tm, N)
    d1 = diag_col_ref[...].astype(cdt)                   # (tm, 1) -> scores[i, i] per row
    d2 = diag_row_ref[...].astype(cdt)                   # (1, N)  -> scores[j, j] per col
    n = s.shape[1]

    # Margin added once; the diagonal is NOT masked here -- its exact contribution
    # (2 * N * relu(margin), assuming finite scores) is subtracted in the wrapper,
    # which removes the iota/compare/select from this hot path.
    t = s if margin == 0.0 else s + margin
    cost = jnp.maximum(t - d1, 0.0) + jnp.maximum(t - d2, 0.0)

    if has_pad:
        # Last tile may read past N rows (garbage): kill those rows with a select.
        step = pl.program_id(0)
        row_ids = step * tm + lax.broadcasted_iota(jnp.int32, (tm, 1), 0)
        cost = jnp.where(row_ids < n_rows, cost, 0.0)

    # Sublane-group fold only (pure VALU); cross-lane reduction deferred to the wrapper,
    # so there is no per-step XLU drain nor loop-carried scalar accumulator.
    folded = cost.astype(jnp.float32).reshape(tm // _SUBLANE, _SUBLANE, n).sum(axis=0)
    psum_ref[0] = folded                                  # (8, N) partial slab


def _max_violation_kernel(diag_row_ref, diag_col_ref, scores_ref,
                          rowsum_ref, colmax_ref, *, margin, tm, n_rows, has_pad):
    """VSE++ path: per-step row-max partial sums and sublane-folded column-max slabs."""
    cdt = _compute_dtype(scores_ref.dtype)
    s = scores_ref[...].astype(cdt)
    d1 = diag_col_ref[...].astype(cdt)
    d2 = diag_row_ref[...].astype(cdt)
    n = s.shape[1]

    step = pl.program_id(0)
    row_ids = step * tm + lax.broadcasted_iota(jnp.int32, (tm, 1), 0)
    col_ids = lax.broadcasted_iota(jnp.int32, (1, n), 1)
    kill = row_ids == col_ids                             # diagonal entries
    if has_pad:
        kill = kill | (row_ids >= n_rows)                 # padded (OOB) rows

    t = s if margin == 0.0 else s + margin
    # Select-to-zero (not -inf) so non-finite / garbage values never propagate.
    cost_s = jnp.where(kill, 0.0, jnp.maximum(t - d1, 0.0))
    cost_im = jnp.where(kill, 0.0, jnp.maximum(t - d2, 0.0))

    # Row maxima are complete within the (tm, N) tile: reduce, then fold sublane groups.
    rowmax = jnp.max(cost_s, axis=1, keepdims=True).astype(jnp.float32)       # (tm, 1)
    rowsum_ref[0] = rowmax.reshape(tm // _SUBLANE, _SUBLANE, 1).sum(axis=0)   # (8, 1)

    # Column maxima need all rows: emit a sublane-folded partial slab (pure VALU fold);
    # the max over row tiles + lane reduction + sum happen in the wrapper.
    cmax = cost_im.reshape(tm // _SUBLANE, _SUBLANE, n).max(axis=0)           # (8, N)
    colmax_ref[0] = cmax.astype(jnp.float32)


def contrastive_loss(scores, margin=0.0, max_violation=False, tile_rows=None):
    """JAX/Pallas equivalent of ContrastiveLoss(opt, margin, max_violation).forward(scores)."""
    n = scores.shape[0]
    assert scores.ndim == 2 and scores.shape == (n, n), "scores must be square [N, N]"
    margin = float(margin)
    itemsize = jnp.dtype(scores.dtype).itemsize

    if tile_rows is None:
        tm = _pick_tile_rows(n, itemsize)
    else:
        tm = max(_SUBLANE, _round_up(int(tile_rows), _SUBLANE))
        tm = min(tm, _round_up(n, _SUBLANE))
    num_tiles = pl.cdiv(n, tm)
    has_pad = (num_tiles * tm) != n

    # O(N) diagonal gather outside the kernel (kept in the input dtype: tiny DMA).
    diag = jnp.diagonal(scores)
    diag_row = diag.reshape(1, n)     # d2 source
    diag_col = diag.reshape(n, 1)     # d1 source

    in_specs = [
        pl.BlockSpec((1, n), lambda i: (0, 0)),       # diag_row: grid-invariant
        pl.BlockSpec((tm, 1), lambda i: (i, 0)),      # diag_col: per row tile
        pl.BlockSpec((tm, n), lambda i: (i, 0)),      # scores row tile
    ]
    compiler_params = pltpu.CompilerParams(
        # Per-step partial outputs -> no loop-carried state -> the row-tile axis is
        # embarrassingly parallel (sharded across v7x's 2 TCs; no-op on v5e/v6e).
        dimension_semantics=("parallel",),
        vmem_limit_bytes=_VMEM_LIMIT_BYTES,
    )
    bytes_scores = n * n * itemsize

    if not max_violation:
        kernel = functools.partial(_sum_kernel, margin=margin, tm=tm,
                                   n_rows=n, has_pad=has_pad)
        psum = pl.pallas_call(
            kernel,
            grid=(num_tiles,),
            in_specs=in_specs,
            out_specs=pl.BlockSpec((1, _SUBLANE, n), lambda i: (i, 0, 0)),
            out_shape=jax.ShapeDtypeStruct((num_tiles, _SUBLANE, n), jnp.float32),
            compiler_params=compiler_params,
            cost_estimate=pl.CostEstimate(
                flops=6 * n * n, transcendentals=0,
                bytes_accessed=bytes_scores + (2 * n + num_tiles * _SUBLANE * n) * 4),
        )(diag_row, diag_col, scores)
        # Each (finite) diagonal element contributes relu(margin) to both costs; the
        # reference masks it to 0, so subtract 2*N*relu(margin) analytically.
        return jnp.sum(psum) - 2.0 * n * max(margin, 0.0)

    kernel = functools.partial(_max_violation_kernel, margin=margin, tm=tm,
                               n_rows=n, has_pad=has_pad)
    rowsum, colmax = pl.pallas_call(
        kernel,
        grid=(num_tiles,),
        in_specs=in_specs,
        out_specs=(
            pl.BlockSpec((1, _SUBLANE, 1), lambda i: (i, 0, 0)),
            pl.BlockSpec((1, _SUBLANE, n), lambda i: (i, 0, 0)),
        ),
        out_shape=(
            jax.ShapeDtypeStruct((num_tiles, _SUBLANE, 1), jnp.float32),
            jax.ShapeDtypeStruct((num_tiles, _SUBLANE, n), jnp.float32),
        ),
        compiler_params=compiler_params,
        cost_estimate=pl.CostEstimate(
            flops=8 * n * n, transcendentals=0,
            bytes_accessed=bytes_scores + (2 * n + num_tiles * _SUBLANE * (n + 1)) * 4),
    )(diag_row, diag_col, scores)
    # Masked/padded entries were written as 0 and all costs are >= 0, so the global
    # column max / row-max sum are unaffected by padding.
    return jnp.sum(rowsum) + jnp.sum(jnp.max(colmax, axis=(0, 1)))


def _reference(scores, margin=0.0, max_violation=False):
    scores = scores.astype(jnp.float32)
    n = scores.shape[0]
    diag = jnp.diag(scores).reshape(n, 1)
    d1 = jnp.broadcast_to(diag, (n, n))
    d2 = jnp.broadcast_to(diag.T, (n, n))
    cost_s = jnp.maximum(margin + scores - d1, 0.0)
    cost_im = jnp.maximum(margin + scores - d2, 0.0)
    eye = jnp.eye(n, dtype=bool)
    cost_s = jnp.where(eye, 0.0, cost_s)
    cost_im = jnp.where(eye, 0.0, cost_im)
    if max_violation:
        return jnp.sum(jnp.max(cost_s, axis=1)) + jnp.sum(jnp.max(cost_im, axis=0))
    return jnp.sum(cost_s) + jnp.sum(cost_im)


if __name__ == "__main__":
    key = jax.random.PRNGKey(0)

    def _check(scores, margin, max_violation, rtol=1e-5, atol=1e-4, **kw):
        out = contrastive_loss(scores, margin=margin, max_violation=max_violation, **kw)
        jax.block_until_ready(out)
        ref = _reference(scores, margin=margin, max_violation=max_violation)
        assert jnp.allclose(out, ref, rtol=rtol, atol=atol), (out, ref, margin, max_violation, kw)

    # Module-scale small test: scores is an [N, N] image-caption similarity matrix.
    N = 8
    scores = jax.random.normal(key, (N, N), dtype=jnp.float32)
    _check(scores, 0.0, False)                 # VSE0 (module defaults)
    _check(scores, 0.2, True)                  # VSE++ with nonzero margin

    # Multi-tile (pipelined, parallel-grid) path: 4 row tiles of 16.
    N2 = 64
    scores2 = jax.random.normal(jax.random.PRNGKey(1), (N2, N2), dtype=jnp.float32)
    _check(scores2, 0.1, False, tile_rows=16)
    _check(scores2, 0.1, True, tile_rows=16)

    # Non-divisible N exercises cdiv grid + row-validity masking (3 tiles of 16 for N=40).
    N3 = 40
    scores3 = jax.random.normal(jax.random.PRNGKey(2), (N3, N3), dtype=jnp.float32)
    _check(scores3, 0.2, False, tile_rows=16)
    _check(scores3, 0.2, True, tile_rows=16)

    # bf16 inputs: packed elementwise math, f32 partial accumulation (loose tolerance).
    scores4 = jax.random.normal(jax.random.PRNGKey(3), (N2, N2), dtype=jnp.float32)
    scores4 = scores4.astype(jnp.bfloat16)
    _check(scores4, 0.2, False, tile_rows=16, rtol=2e-2, atol=1.0)
    _check(scores4, 0.2, True, tile_rows=16, rtol=2e-2, atol=1.0)

    print("KERNEL_OK")
</pallas_src>

<mosaic_0001>
module attributes {stable_mosaic.version = 11 : i64} {
  func.func @_sum_kernel(%arg0: i32, %arg1: memref<1x8xf32, #tpu.memory_space<vmem>>, %arg2: memref<8x1xf32, #tpu.memory_space<vmem>>, %arg3: memref<8x8xf32, #tpu.memory_space<vmem>>, %arg4: memref<1x8x8xf32, #tpu.memory_space<vmem>>) attributes {dimension_semantics = [#tpu.dimension_semantics<parallel>], iteration_bounds = array<i64: 1>, scalar_prefetch = 0 : i64, scratch_operands = 0 : i64, tpu.core_type = #tpu.core_type<tc>, window_params = [{pipeline_mode = #tpu.pipeline_mode<synchronous>, transform_indices = @transform_0, window_bounds = array<i64: 1, 8>}, {transform_indices = @transform_1, window_bounds = array<i64: 8, 1>}, {transform_indices = @transform_2, window_bounds = array<i64: 8, 8>}, {transform_indices = @transform_3, window_bounds = array<i64: 1, 8, 8>}]} {
    %c0 = arith.constant 0 : index
    %c0_0 = arith.constant 0 : index
    %0 = vector.load %arg3[%c0, %c0_0] : memref<8x8xf32, #tpu.memory_space<vmem>>, vector<8x8xf32>
    %c0_1 = arith.constant 0 : index
    %c0_2 = arith.constant 0 : index
    %1 = vector.load %arg2[%c0_1, %c0_2] : memref<8x1xf32, #tpu.memory_space<vmem>>, vector<8x1xf32>
    %c0_3 = arith.constant 0 : index
    %c0_4 = arith.constant 0 : index
    %2 = vector.load %arg1[%c0_3, %c0_4] : memref<1x8xf32, #tpu.memory_space<vmem>>, vector<1x8xf32>
    %3 = vector.broadcast %1 : vector<8x1xf32> to vector<8x8xf32>
    %4 = arith.subf %0, %3 : vector<8x8xf32>
    %cst = arith.constant 0.000000e+00 : f32
    %5 = vector.broadcast %cst : f32 to vector<8x8xf32>
    %6 = arith.maximumf %4, %5 : vector<8x8xf32>
    %7 = vector.broadcast %2 : vector<1x8xf32> to vector<8x8xf32>
    %8 = arith.subf %0, %7 : vector<8x8xf32>
    %cst_5 = arith.constant 0.000000e+00 : f32
    %9 = vector.broadcast %cst_5 : f32 to vector<8x8xf32>
    %10 = arith.maximumf %8, %9 : vector<8x8xf32>
    %11 = arith.addf %6, %10 : vector<8x8xf32>
    %12 = vector.shape_cast %11 : vector<8x8xf32> to vector<1x8x8xf32>
    %cst_6 = arith.constant dense<0.000000e+00> : vector<8x8xf32>
    %13 = vector.multi_reduction <add>, %12, %cst_6 [0] : vector<1x8x8xf32> to vector<8x8xf32>
    %c0_7 = arith.constant 0 : index
    %c0_8 = arith.constant 0 : index
    %c0_9 = arith.constant 0 : index
    %14 = vector.load %arg4[%c0_7, %c0_8, %c0_9] : memref<1x8x8xf32, #tpu.memory_space<vmem>>, vector<1x8x8xf32>
    %15 = vector.shape_cast %14 : vector<1x8x8xf32> to vector<8x8xf32>
    %16 = vector.shape_cast %13 : vector<8x8xf32> to vector<1x8x8xf32>
    tpu.vector_store %arg4[%c0_7, %c0_8, %c0_9], %16 {strides = array<i32>} : memref<1x8x8xf32, #tpu.memory_space<vmem>>, vector<1x8x8xf32>,
    return
  }
  func.func @transform_0(%arg0: i32) -> (i32, i32) {
    %c0_i32 = arith.constant 0 : i32
    %c0_i32_0 = arith.constant 0 : i32
    %c0_i32_1 = arith.constant 0 : i32
    return %c0_i32, %c0_i32_0 : i32, i32
  }
  func.func @transform_1(%arg0: i32) -> (i32, i32) {
    %c0_i32 = arith.constant 0 : i32
    %c0_i32_0 = arith.constant 0 : i32
    return %arg0, %c0_i32 : i32, i32
  }
  func.func @transform_2(%arg0: i32) -> (i32, i32) {
    %c0_i32 = arith.constant 0 : i32
    %c0_i32_0 = arith.constant 0 : i32
    return %arg0, %c0_i32 : i32, i32
  }
  func.func @transform_3(%arg0: i32) -> (i32, i32, i32) {
    %c0_i32 = arith.constant 0 : i32
    %c0_i32_0 = arith.constant 0 : i32
    %c0_i32_1 = arith.constant 0 : i32
    return %arg0, %c0_i32, %c0_i32_0 : i32, i32, i32
  }
}

</mosaic_0001>

<bundles_post_ra>
// kernel: tpu_custom_call.1
= control target key start
LH: loop header
LB: loop body
LE: loop exit
PB: predicated region body
PF: predicated region fallthrough
CT: control target
= control target key end

     0   :  { %s122_s0 = inlined_call_operand.vmem [shape: f32[1,8], index: 0, kind: input, shape index: {}]   ;;  %s123_s1 = inlined_call_operand.vmem [shape: f32[8,1], index: 1, kind: input, shape index: {}]   ;;  %s124_s2 = inlined_call_operand.vmem [shape: f32[8,8], index: 2, kind: input, shape index: {}]   ;;  %s125_s3 = inlined_call_operand.hbm [shape: f32[1,8,8], index: 3, kind: output, shape index: {}]  }
   0x1   :  { %v16_v0 = vld [vmem:[%s123_s1] sm:$0xff] }
   0x2   :  { %8 = vsyncpa [#allocation3], 0  ;;  %v79_v1 = vmov 0   ;;  %v51_v2 = vld [vmem:[%s122_s0] ss:$0 sm:$0xff]  ;;  %s80_s18 = smov [#allocation2]  }
   0x3   :  { %54 = vset.pattern.permute.xlu0 %v79_v1  ;;  %v15_v3 = vld [vmem:[%s124_s2] sm:$0xff]  ;;  %s43_s19 = sshll.u32 %s80_s18, 4  ;;  %vm35_vm0 = vcmask 64512   ;;  %s44_s19 = int_to_ptr.vmem [resolvable:$true] %s43_s19 }
   0x4   :  { %20 = vperm.xlu0 %54, %v16_v0   ;;  %v31_v4 = vsub.f32 %v15_v3, %v51_v2  ;;  %s55_s1 = scalar_lea.vmem %s44_s19, 128  ;;  %p60_p1 = scmp.lt.s32.totalorder %s44_s19, %s44_s19 }
   0x5   :  { %p56_p0 = scmp.ne.s32.totalorder %s44_s19, %s55_s1  ;;  %p61_p2 = scmp.lt.s32.totalorder %s55_s1, %s55_s1 }
   0x6   :  { %v32_v7 = vmax.f32 %v31_v4, 0.0 }
   0x7   :  { %p62_p3 = por %p61_p2, %p60_p1 }
   0x9   :  { %p63_p4 = pnand %p62_p3, %p56_p0 }
  0x83   :  { %v21_v5 = vpop.permute.xlu0 %20 }
  0x84   :  { %v23_v6 = vsub.f32 %v15_v3, %v21_v5 }
  0x86   :  { %v24_v8 = vmax.f32 %v23_v6, 0.0 }
  0x88   :  { %v33_v9 = vadd.f32 %v32_v7, %v24_v8 }
  0x8a   :  { %36 = vst.msk [vmem:[#allocation2] sm:$0xff] %vm35_vm0, %v33_v9 }
  0x8b   :  { %66 = shalt.err (!%p63_p4)
}
  0x8c   :  { %s67_s20 = scalar_lea.hbm %s125_s3, 128 }
  0x8d   :  { %p68_p5 = scmp.ne.s32.totalorder %s125_s3, %s67_s20  ;;  %p71_p6 = scmp.lt.u32.totalorder %s67_s20, %s125_s3 }
  0x8f   :  { %p73_p7 = pnand %p71_p6, %p68_p5 }
  0x91   :  { %76 = shalt.err (!%p73_p7)
}
  0x92   :  { %46 = dma.vmem_to_hbm [thread:$0]  %s44_s19, 128, %s125_s3, [#allocation3]  }
  0x93   :  { %77 = dma.done.wait [#allocation3], 128  }
  0x94   :  { %78 = vsyncadd [#allocation3], 4294967168 }
  0x95   :  { %50 = vsyncpa [#allocation3], 1 }

</bundles_post_ra>
